<compile_context>
chip_gen: v5e
topology: v5e:2x2
jax: 0.10.0
libtpu: 0.0.40
codegen_flags: <defaults>
</compile_context>

<pallas_src>
import functools

import jax
import jax.numpy as jnp
from jax.experimental import pallas as pl
from jax.experimental.pallas import tpu as pltpu


def _dilated_conv_acc(x_ref, w_ref, xpad_ref, *, H, d):
    """Shared conv body: dilated 3x3 conv for one batch element, returns f32 (H, W*Cout).

    x_ref:    (1, H, W*Cin)       bf16  NHWC input, width and channels flattened together
    w_ref:    (3, W*Cin, W*Cout)  bf16  width-structured weights (kw taps, Cin and width
                                        padding all folded in)
    xpad_ref: (H+2d, W*Cin)       bf16  VMEM scratch: row-padded input (width needs no pad)
    """
    # In-kernel zero row-padding (no jnp.pad HBM round trip); interior copy is full-lane.
    xpad_ref[...] = jnp.zeros(xpad_ref.shape, xpad_ref.dtype)
    xpad_ref[d:d + H, :] = x_ref[0]

    # 3 row-band matmuls (one per kh tap row), bf16 in / f32 accumulate.  The kw taps, the Cin
    # contraction and the width zero-padding all live inside w_ref, so there is no 9-tap im2col
    # materialization and the MXU output is already in the lane-dense (H, W*Cout) layout.
    acc = jnp.zeros((H, w_ref.shape[-1]), dtype=jnp.float32)
    for kh in range(3):
        acc = acc + jnp.dot(xpad_ref[kh * d:kh * d + H, :], w_ref[kh],
                            preferred_element_type=jnp.float32)
    return acc


def _conv_stats_kernel(x_ref, w_ref, sum_ref, sumsq_ref, xpad_ref, *, H, d):
    """Pass 1: conv for one batch element, emit only BN partial statistics (no conv store)."""
    acc = _dilated_conv_acc(x_ref, w_ref, xpad_ref, H=H, d=d)
    sum_ref[0] = jnp.sum(acc, axis=0, keepdims=True)
    sumsq_ref[0] = jnp.sum(acc * acc, axis=0, keepdims=True)


def _conv_bn_relu_kernel(x_ref, w_ref, scale_ref, shift_ref, out_ref, xpad_ref, *, H, d):
    """Pass 2: recompute the conv (bit-identical to pass 1) and fuse normalize + ReLU."""
    acc = _dilated_conv_acc(x_ref, w_ref, xpad_ref, H=H, d=d)
    y = acc * scale_ref[...] + shift_ref[...]
    out_ref[0] = jnp.maximum(y, 0.0)


def cbr_forward(x_nchw, w_hwio, bias, gamma, beta, dilation_rate, eps=1e-5):
    """CBR forward.  x_nchw: (N, Cin, H, W); w_hwio: (3, 3, Cin, Cout)."""
    del bias  # cancels exactly in train-mode BN (batch mean shifts equally, variance unchanged)
    N, Cin, H, W = x_nchw.shape
    Cout = w_hwio.shape[-1]
    d = int(dilation_rate)

    # NHWC with width/channels flattened; bf16 feeds the MXU (f32 accumulation in-kernel).
    x2 = jnp.transpose(x_nchw, (0, 2, 3, 1)).reshape(N, H, W * Cin).astype(jnp.bfloat16)

    # Width-structured weight matrix with width padding folded in:
    #   wmat[kh, wp*Cin + cin, w*Cout + c] = sum_kw w_hwio[kh, kw, cin, c] * [wp == w + (kw-1)*d]
    # Out-of-range taps (w + (kw-1)*d outside [0, W)) simply have no matching column -> zero.
    sel = (jnp.arange(W)[None, :, None]
           == jnp.arange(W)[None, None, :] + d * (jnp.arange(3)[:, None, None] - 1))
    wmat = jnp.einsum("kpw,hkic->hpiwc", sel.astype(jnp.float32),
                      w_hwio.astype(jnp.float32))
    wmat = wmat.reshape(3, W * Cin, W * Cout).astype(jnp.bfloat16)

    # Pass 1: per-batch-element BN partial statistics (sum / sum-of-squares over H).
    psum, psumsq = pl.pallas_call(
        functools.partial(_conv_stats_kernel, H=H, d=d),
        out_shape=(
            jax.ShapeDtypeStruct((N, 1, W * Cout), jnp.float32),
            jax.ShapeDtypeStruct((N, 1, W * Cout), jnp.float32),
        ),
        grid_spec=pltpu.PrefetchScalarGridSpec(
            num_scalar_prefetch=0,
            grid=(N,),
            in_specs=[
                pl.BlockSpec((1, H, W * Cin), lambda n: (n, 0, 0)),
                pl.BlockSpec((3, W * Cin, W * Cout), lambda n: (0, 0, 0)),
            ],
            out_specs=(
                pl.BlockSpec((1, 1, W * Cout), lambda n: (n, 0, 0)),
                pl.BlockSpec((1, 1, W * Cout), lambda n: (n, 0, 0)),
            ),
            scratch_shapes=[pltpu.VMEM((H + 2 * d, W * Cin), jnp.bfloat16)],
        ),
        compiler_params=pltpu.CompilerParams(
            dimension_semantics=("parallel",)),
    )(x2, wmat)

    # Finish the (tiny, per-channel) statistics reduction and fold with gamma/beta (f32).
    count = jnp.float32(N * H * W)
    ch_sum = jnp.sum(psum.reshape(N, W, Cout), axis=(0, 1))
    ch_sumsq = jnp.sum(psumsq.reshape(N, W, Cout), axis=(0, 1))
    mean = ch_sum / count
    var = ch_sumsq / count - mean * mean                       # biased variance (train-mode BN)
    inv = jax.lax.rsqrt(var + jnp.float32(eps))
    scale = gamma.astype(jnp.float32) * inv
    shift = beta.astype(jnp.float32) - mean * scale
    scale_t = jnp.tile(scale, W).reshape(1, W * Cout)           # lane-dense broadcast vectors
    shift_t = jnp.tile(shift, W).reshape(1, W * Cout)

    # Pass 2: recompute conv (bit-identical) + fused normalize + ReLU, lane-dense output.
    y = pl.pallas_call(
        functools.partial(_conv_bn_relu_kernel, H=H, d=d),
        out_shape=jax.ShapeDtypeStruct((N, H, W * Cout), jnp.float32),
        grid_spec=pltpu.PrefetchScalarGridSpec(
            num_scalar_prefetch=0,
            grid=(N,),
            in_specs=[
                pl.BlockSpec((1, H, W * Cin), lambda n: (n, 0, 0)),
                pl.BlockSpec((3, W * Cin, W * Cout), lambda n: (0, 0, 0)),
                pl.BlockSpec((1, W * Cout), lambda n: (0, 0)),
                pl.BlockSpec((1, W * Cout), lambda n: (0, 0)),
            ],
            out_specs=pl.BlockSpec((1, H, W * Cout), lambda n: (n, 0, 0)),
            scratch_shapes=[pltpu.VMEM((H + 2 * d, W * Cin), jnp.bfloat16)],
        ),
        compiler_params=pltpu.CompilerParams(
            dimension_semantics=("parallel",)),
    )(x2, wmat, scale_t, shift_t)

    # TODO(synk): in a full network keep activations NHWC / lane-dense end-to-end; this
    # transpose only exists to match PyTorch's NCHW output contract.
    return jnp.transpose(y.reshape(N, H, W, Cout), (0, 3, 1, 2))


def _reference(x_nchw, w_hwio, bias, gamma, beta, d, eps=1e-5):
    Cout = w_hwio.shape[-1]
    w_oihw = jnp.transpose(w_hwio, (3, 2, 0, 1))
    conv = jax.lax.conv_general_dilated(
        x_nchw.astype(jnp.float32), w_oihw.astype(jnp.float32),
        window_strides=(1, 1), padding=[(d, d), (d, d)],
        rhs_dilation=(d, d),
        dimension_numbers=("NCHW", "OIHW", "NCHW"))
    conv = conv + bias.reshape(1, Cout, 1, 1)
    mean = conv.mean(axis=(0, 2, 3), keepdims=True)
    var = ((conv - mean) ** 2).mean(axis=(0, 2, 3), keepdims=True)  # biased
    y = (conv - mean) / jnp.sqrt(var + eps)
    y = y * gamma.reshape(1, Cout, 1, 1) + beta.reshape(1, Cout, 1, 1)
    return jnp.maximum(y, 0.0)


if __name__ == "__main__":
    # Shapes consistent with the module: CBR(in_c=4, out_c=8, dilation_rate=2)
    N, Cin, Cout, H, W, d = 2, 4, 8, 16, 16, 2

    key = jax.random.PRNGKey(0)
    kx, kw, kb, kg, kbt = jax.random.split(key, 5)
    x = jax.random.normal(kx, (N, Cin, H, W), dtype=jnp.float32)           # NCHW input
    w = jax.random.normal(kw, (3, 3, Cin, Cout), dtype=jnp.float32) * 0.1   # HWIO weights
    b = jax.random.normal(kb, (Cout,), dtype=jnp.float32) * 0.1
    gamma = 1.0 + 0.1 * jax.random.normal(kg, (Cout,), dtype=jnp.float32)
    beta = 0.1 * jax.random.normal(kbt, (Cout,), dtype=jnp.float32)

    fwd = jax.jit(cbr_forward, static_argnames=("dilation_rate", "eps"))
    out = jax.block_until_ready(fwd(x, w, b, gamma, beta, dilation_rate=d))

    ref = _reference(x, w, b, gamma, beta, d)
    assert out.shape == (N, Cout, H, W), out.shape
    # bf16 MXU inputs (f32 accumulation) vs a pure-f32 reference -> loosened tolerance.
    if not jnp.allclose(out, ref, rtol=2e-2, atol=2e-2):
        err = float(jnp.max(jnp.abs(out - ref)))
        raise AssertionError(f"Pallas CBR output does not match reference (max abs err {err})")

    print("KERNEL_OK")
</pallas_src>

<mosaic_0001>
module attributes {stable_mosaic.version = 11 : i64} {
  func.func @_conv_stats_kernel(%arg0: i32, %arg1: memref<1x16x64xbf16, #tpu.memory_space<vmem>>, %arg2: memref<3x64x128xbf16, #tpu.memory_space<vmem>>, %arg3: memref<1x1x128xf32, #tpu.memory_space<vmem>>, %arg4: memref<1x1x128xf32, #tpu.memory_space<vmem>>, %arg5: memref<20x64xbf16, #tpu.memory_space<vmem>>) attributes {dimension_semantics = [#tpu.dimension_semantics<parallel>], iteration_bounds = array<i64: 2>, scalar_prefetch = 0 : i64, scratch_operands = 1 : i64, tpu.core_type = #tpu.core_type<tc>, window_params = [{transform_indices = @transform_0, window_bounds = array<i64: 1, 16, 64>}, {pipeline_mode = #tpu.pipeline_mode<synchronous>, transform_indices = @transform_1, window_bounds = array<i64: 3, 64, 128>}, {transform_indices = @transform_2, window_bounds = array<i64: 1, 1, 128>}, {transform_indices = @transform_3, window_bounds = array<i64: 1, 1, 128>}]} {
    %cst = arith.constant 0.000000e+00 : bf16
    %0 = vector.broadcast %cst : bf16 to vector<20x64xbf16>
    %c0 = arith.constant 0 : index
    %c0_0 = arith.constant 0 : index
    %1 = vector.load %arg5[%c0, %c0_0] : memref<20x64xbf16, #tpu.memory_space<vmem>>, vector<20x64xbf16>
    tpu.vector_store %arg5[%c0, %c0_0], %0 {strides = array<i32>} : memref<20x64xbf16, #tpu.memory_space<vmem>>, vector<20x64xbf16>,
    %c0_1 = arith.constant 0 : index
    %c0_2 = arith.constant 0 : index
    %c0_3 = arith.constant 0 : index
    %2 = vector.load %arg1[%c0_1, %c0_2, %c0_3] : memref<1x16x64xbf16, #tpu.memory_space<vmem>>, vector<1x16x64xbf16>
    %3 = vector.shape_cast %2 : vector<1x16x64xbf16> to vector<16x64xbf16>
    %c2 = arith.constant 2 : index
    %c0_4 = arith.constant 0 : index
    %4 = vector.load %arg5[%c2, %c0_4] : memref<20x64xbf16, #tpu.memory_space<vmem>>, vector<16x64xbf16>
    tpu.vector_store %arg5[%c2, %c0_4], %3 {strides = array<i32>} : memref<20x64xbf16, #tpu.memory_space<vmem>>, vector<16x64xbf16>,
    %cst_5 = arith.constant 0.000000e+00 : f32
    %5 = vector.broadcast %cst_5 : f32 to vector<16x128xf32>
    %c0_6 = arith.constant 0 : index
    %c0_7 = arith.constant 0 : index
    %6 = vector.load %arg5[%c0_6, %c0_7] : memref<20x64xbf16, #tpu.memory_space<vmem>>, vector<16x64xbf16>
    %c0_8 = arith.constant 0 : index
    %c0_9 = arith.constant 0 : index
    %c0_10 = arith.constant 0 : index
    %7 = vector.load %arg2[%c0_8, %c0_9, %c0_10] : memref<3x64x128xbf16, #tpu.memory_space<vmem>>, vector<1x64x128xbf16>
    %8 = vector.shape_cast %7 : vector<1x64x128xbf16> to vector<64x128xbf16>
    %cst_11 = arith.constant dense<0.000000e+00> : vector<16x128xf32>
    %9 = tpu.matmul %6, %8, %cst_11 {dimension_numbers = #tpu.dot_dimension_numbers<[1], [0], [0], [1], [0, 0, 1, 1], [], []>} : vector<16x64xbf16>, vector<64x128xbf16>, vector<16x128xf32> -> vector<16x128xf32>
    %10 = arith.addf %5, %9 : vector<16x128xf32>
    %c2_12 = arith.constant 2 : index
    %c0_13 = arith.constant 0 : index
    %11 = vector.load %arg5[%c2_12, %c0_13] : memref<20x64xbf16, #tpu.memory_space<vmem>>, vector<16x64xbf16>
    %c1 = arith.constant 1 : index
    %c0_14 = arith.constant 0 : index
    %c0_15 = arith.constant 0 : index
    %12 = vector.load %arg2[%c1, %c0_14, %c0_15] : memref<3x64x128xbf16, #tpu.memory_space<vmem>>, vector<1x64x128xbf16>
    %13 = vector.shape_cast %12 : vector<1x64x128xbf16> to vector<64x128xbf16>
    %cst_16 = arith.constant dense<0.000000e+00> : vector<16x128xf32>
    %14 = tpu.matmul %11, %13, %cst_16 {dimension_numbers = #tpu.dot_dimension_numbers<[1], [0], [0], [1], [0, 0, 1, 1], [], []>} : vector<16x64xbf16>, vector<64x128xbf16>, vector<16x128xf32> -> vector<16x128xf32>
    %15 = arith.addf %10, %14 : vector<16x128xf32>
    %c4 = arith.constant 4 : index
    %c0_17 = arith.constant 0 : index
    %16 = vector.load %arg5[%c4, %c0_17] : memref<20x64xbf16, #tpu.memory_space<vmem>>, vector<16x64xbf16>
    %c2_18 = arith.constant 2 : index
    %c0_19 = arith.constant 0 : index
    %c0_20 = arith.constant 0 : index
    %17 = vector.load %arg2[%c2_18, %c0_19, %c0_20] : memref<3x64x128xbf16, #tpu.memory_space<vmem>>, vector<1x64x128xbf16>
    %18 = vector.shape_cast %17 : vector<1x64x128xbf16> to vector<64x128xbf16>
    %cst_21 = arith.constant dense<0.000000e+00> : vector<16x128xf32>
    %19 = tpu.matmul %16, %18, %cst_21 {dimension_numbers = #tpu.dot_dimension_numbers<[1], [0], [0], [1], [0, 0, 1, 1], [], []>} : vector<16x64xbf16>, vector<64x128xbf16>, vector<16x128xf32> -> vector<16x128xf32>
    %20 = arith.addf %15, %19 : vector<16x128xf32>
    %cst_22 = arith.constant dense<0.000000e+00> : vector<128xf32>
    %21 = vector.multi_reduction <add>, %20, %cst_22 [0] : vector<16x128xf32> to vector<128xf32>
    %22 = vector.shape_cast %21 : vector<128xf32> to vector<1x128xf32>
    %c0_23 = arith.constant 0 : index
    %c0_24 = arith.constant 0 : index
    %c0_25 = arith.constant 0 : index
    %23 = vector.load %arg3[%c0_23, %c0_24, %c0_25] : memref<1x1x128xf32, #tpu.memory_space<vmem>>, vector<1x1x128xf32>
    %24 = vector.shape_cast %23 : vector<1x1x128xf32> to vector<1x128xf32>
    %25 = vector.shape_cast %22 : vector<1x128xf32> to vector<1x1x128xf32>
    tpu.vector_store %arg3[%c0_23, %c0_24, %c0_25], %25 {strides = array<i32>} : memref<1x1x128xf32, #tpu.memory_space<vmem>>, vector<1x1x128xf32>,
    %26 = arith.mulf %20, %20 : vector<16x128xf32>
    %cst_26 = arith.constant dense<0.000000e+00> : vector<128xf32>
    %27 = vector.multi_reduction <add>, %26, %cst_26 [0] : vector<16x128xf32> to vector<128xf32>
    %28 = vector.shape_cast %27 : vector<128xf32> to vector<1x128xf32>
    %c0_27 = arith.constant 0 : index
    %c0_28 = arith.constant 0 : index
    %c0_29 = arith.constant 0 : index
    %29 = vector.load %arg4[%c0_27, %c0_28, %c0_29] : memref<1x1x128xf32, #tpu.memory_space<vmem>>, vector<1x1x128xf32>
    %30 = vector.shape_cast %29 : vector<1x1x128xf32> to vector<1x128xf32>
    %31 = vector.shape_cast %28 : vector<1x128xf32> to vector<1x1x128xf32>
    tpu.vector_store %arg4[%c0_27, %c0_28, %c0_29], %31 {strides = array<i32>} : memref<1x1x128xf32, #tpu.memory_space<vmem>>, vector<1x1x128xf32>,
    return
  }
  func.func @transform_0(%arg0: i32) -> (i32, i32, i32) {
    %c0_i32 = arith.constant 0 : i32
    %c0_i32_0 = arith.constant 0 : i32
    %c0_i32_1 = arith.constant 0 : i32
    return %arg0, %c0_i32, %c0_i32_0 : i32, i32, i32
  }
  func.func @transform_1(%arg0: i32) -> (i32, i32, i32) {
    %c0_i32 = arith.constant 0 : i32
    %c0_i32_0 = arith.constant 0 : i32
    %c0_i32_1 = arith.constant 0 : i32
    %c0_i32_2 = arith.constant 0 : i32
    return %c0_i32, %c0_i32_0, %c0_i32_1 : i32, i32, i32
  }
  func.func @transform_2(%arg0: i32) -> (i32, i32, i32) {
    %c0_i32 = arith.constant 0 : i32
    %c0_i32_0 = arith.constant 0 : i32
    %c0_i32_1 = arith.constant 0 : i32
    return %arg0, %c0_i32, %c0_i32_0 : i32, i32, i32
  }
  func.func @transform_3(%arg0: i32) -> (i32, i32, i32) {
    %c0_i32 = arith.constant 0 : i32
    %c0_i32_0 = arith.constant 0 : i32
    %c0_i32_1 = arith.constant 0 : i32
    return %arg0, %c0_i32, %c0_i32_0 : i32, i32, i32
  }
}

module attributes {stable_mosaic.version = 11 : i64} {
  func.func @_conv_bn_relu_kernel(%arg0: i32, %arg1: memref<1x16x64xbf16, #tpu.memory_space<vmem>>, %arg2: memref<3x64x128xbf16, #tpu.memory_space<vmem>>, %arg3: memref<1x128xf32, #tpu.memory_space<vmem>>, %arg4: memref<1x128xf32, #tpu.memory_space<vmem>>, %arg5: memref<1x16x128xf32, #tpu.memory_space<vmem>>, %arg6: memref<20x64xbf16, #tpu.memory_space<vmem>>) attributes {dimension_semantics = [#tpu.dimension_semantics<parallel>], iteration_bounds = array<i64: 2>, scalar_prefetch = 0 : i64, scratch_operands = 1 : i64, tpu.core_type = #tpu.core_type<tc>, window_params = [{transform_indices = @transform_0, window_bounds = array<i64: 1, 16, 64>}, {pipeline_mode = #tpu.pipeline_mode<synchronous>, transform_indices = @transform_1, window_bounds = array<i64: 3, 64, 128>}, {pipeline_mode = #tpu.pipeline_mode<synchronous>, transform_indices = @transform_2, window_bounds = array<i64: 1, 128>}, {pipeline_mode = #tpu.pipeline_mode<synchronous>, transform_indices = @transform_3, window_bounds = array<i64: 1, 128>}, {transform_indices = @transform_4, window_bounds = array<i64: 1, 16, 128>}]} {
    %cst = arith.constant 0.000000e+00 : bf16
    %0 = vector.broadcast %cst : bf16 to vector<20x64xbf16>
    %c0 = arith.constant 0 : index
    %c0_0 = arith.constant 0 : index
    %1 = vector.load %arg6[%c0, %c0_0] : memref<20x64xbf16, #tpu.memory_space<vmem>>, vector<20x64xbf16>
    tpu.vector_store %arg6[%c0, %c0_0], %0 {strides = array<i32>} : memref<20x64xbf16, #tpu.memory_space<vmem>>, vector<20x64xbf16>,
    %c0_1 = arith.constant 0 : index
    %c0_2 = arith.constant 0 : index
    %c0_3 = arith.constant 0 : index
    %2 = vector.load %arg1[%c0_1, %c0_2, %c0_3] : memref<1x16x64xbf16, #tpu.memory_space<vmem>>, vector<1x16x64xbf16>
    %3 = vector.shape_cast %2 : vector<1x16x64xbf16> to vector<16x64xbf16>
    %c2 = arith.constant 2 : index
    %c0_4 = arith.constant 0 : index
    %4 = vector.load %arg6[%c2, %c0_4] : memref<20x64xbf16, #tpu.memory_space<vmem>>, vector<16x64xbf16>
    tpu.vector_store %arg6[%c2, %c0_4], %3 {strides = array<i32>} : memref<20x64xbf16, #tpu.memory_space<vmem>>, vector<16x64xbf16>,
    %cst_5 = arith.constant 0.000000e+00 : f32
    %5 = vector.broadcast %cst_5 : f32 to vector<16x128xf32>
    %c0_6 = arith.constant 0 : index
    %c0_7 = arith.constant 0 : index
    %6 = vector.load %arg6[%c0_6, %c0_7] : memref<20x64xbf16, #tpu.memory_space<vmem>>, vector<16x64xbf16>
    %c0_8 = arith.constant 0 : index
    %c0_9 = arith.constant 0 : index
    %c0_10 = arith.constant 0 : index
    %7 = vector.load %arg2[%c0_8, %c0_9, %c0_10] : memref<3x64x128xbf16, #tpu.memory_space<vmem>>, vector<1x64x128xbf16>
    %8 = vector.shape_cast %7 : vector<1x64x128xbf16> to vector<64x128xbf16>
    %cst_11 = arith.constant dense<0.000000e+00> : vector<16x128xf32>
    %9 = tpu.matmul %6, %8, %cst_11 {dimension_numbers = #tpu.dot_dimension_numbers<[1], [0], [0], [1], [0, 0, 1, 1], [], []>} : vector<16x64xbf16>, vector<64x128xbf16>, vector<16x128xf32> -> vector<16x128xf32>
    %10 = arith.addf %5, %9 : vector<16x128xf32>
    %c2_12 = arith.constant 2 : index
    %c0_13 = arith.constant 0 : index
    %11 = vector.load %arg6[%c2_12, %c0_13] : memref<20x64xbf16, #tpu.memory_space<vmem>>, vector<16x64xbf16>
    %c1 = arith.constant 1 : index
    %c0_14 = arith.constant 0 : index
    %c0_15 = arith.constant 0 : index
    %12 = vector.load %arg2[%c1, %c0_14, %c0_15] : memref<3x64x128xbf16, #tpu.memory_space<vmem>>, vector<1x64x128xbf16>
    %13 = vector.shape_cast %12 : vector<1x64x128xbf16> to vector<64x128xbf16>
    %cst_16 = arith.constant dense<0.000000e+00> : vector<16x128xf32>
    %14 = tpu.matmul %11, %13, %cst_16 {dimension_numbers = #tpu.dot_dimension_numbers<[1], [0], [0], [1], [0, 0, 1, 1], [], []>} : vector<16x64xbf16>, vector<64x128xbf16>, vector<16x128xf32> -> vector<16x128xf32>
    %15 = arith.addf %10, %14 : vector<16x128xf32>
    %c4 = arith.constant 4 : index
    %c0_17 = arith.constant 0 : index
    %16 = vector.load %arg6[%c4, %c0_17] : memref<20x64xbf16, #tpu.memory_space<vmem>>, vector<16x64xbf16>
    %c2_18 = arith.constant 2 : index
    %c0_19 = arith.constant 0 : index
    %c0_20 = arith.constant 0 : index
    %17 = vector.load %arg2[%c2_18, %c0_19, %c0_20] : memref<3x64x128xbf16, #tpu.memory_space<vmem>>, vector<1x64x128xbf16>
    %18 = vector.shape_cast %17 : vector<1x64x128xbf16> to vector<64x128xbf16>
    %cst_21 = arith.constant dense<0.000000e+00> : vector<16x128xf32>
    %19 = tpu.matmul %16, %18, %cst_21 {dimension_numbers = #tpu.dot_dimension_numbers<[1], [0], [0], [1], [0, 0, 1, 1], [], []>} : vector<16x64xbf16>, vector<64x128xbf16>, vector<16x128xf32> -> vector<16x128xf32>
    %20 = arith.addf %15, %19 : vector<16x128xf32>
    %c0_22 = arith.constant 0 : index
    %c0_23 = arith.constant 0 : index
    %21 = vector.load %arg3[%c0_22, %c0_23] : memref<1x128xf32, #tpu.memory_space<vmem>>, vector<1x128xf32>
    %22 = vector.broadcast %21 : vector<1x128xf32> to vector<16x128xf32>
    %23 = arith.mulf %20, %22 : vector<16x128xf32>
    %c0_24 = arith.constant 0 : index
    %c0_25 = arith.constant 0 : index
    %24 = vector.load %arg4[%c0_24, %c0_25] : memref<1x128xf32, #tpu.memory_space<vmem>>, vector<1x128xf32>
    %25 = vector.broadcast %24 : vector<1x128xf32> to vector<16x128xf32>
    %26 = arith.addf %23, %25 : vector<16x128xf32>
    %cst_26 = arith.constant 0.000000e+00 : f32
    %27 = vector.broadcast %cst_26 : f32 to vector<16x128xf32>
    %28 = arith.maximumf %26, %27 : vector<16x128xf32>
    %c0_27 = arith.constant 0 : index
    %c0_28 = arith.constant 0 : index
    %c0_29 = arith.constant 0 : index
    %29 = vector.load %arg5[%c0_27, %c0_28, %c0_29] : memref<1x16x128xf32, #tpu.memory_space<vmem>>, vector<1x16x128xf32>
    %30 = vector.shape_cast %29 : vector<1x16x128xf32> to vector<16x128xf32>
    %31 = vector.shape_cast %28 : vector<16x128xf32> to vector<1x16x128xf32>
    tpu.vector_store %arg5[%c0_27, %c0_28, %c0_29], %31 {strides = array<i32>} : memref<1x16x128xf32, #tpu.memory_space<vmem>>, vector<1x16x128xf32>,
    return
  }
  func.func @transform_0(%arg0: i32) -> (i32, i32, i32) {
    %c0_i32 = arith.constant 0 : i32
    %c0_i32_0 = arith.constant 0 : i32
    %c0_i32_1 = arith.constant 0 : i32
    return %arg0, %c0_i32, %c0_i32_0 : i32, i32, i32
  }
  func.func @transform_1(%arg0: i32) -> (i32, i32, i32) {
    %c0_i32 = arith.constant 0 : i32
    %c0_i32_0 = arith.constant 0 : i32
    %c0_i32_1 = arith.constant 0 : i32
    %c0_i32_2 = arith.constant 0 : i32
    return %c0_i32, %c0_i32_0, %c0_i32_1 : i32, i32, i32
  }
  func.func @transform_2(%arg0: i32) -> (i32, i32) {
    %c0_i32 = arith.constant 0 : i32
    %c0_i32_0 = arith.constant 0 : i32
    %c0_i32_1 = arith.constant 0 : i32
    return %c0_i32, %c0_i32_0 : i32, i32
  }
  func.func @transform_3(%arg0: i32) -> (i32, i32) {
    %c0_i32 = arith.constant 0 : i32
    %c0_i32_0 = arith.constant 0 : i32
    %c0_i32_1 = arith.constant 0 : i32
    return %c0_i32, %c0_i32_0 : i32, i32
  }
  func.func @transform_4(%arg0: i32) -> (i32, i32, i32) {
    %c0_i32 = arith.constant 0 : i32
    %c0_i32_0 = arith.constant 0 : i32
    %c0_i32_1 = arith.constant 0 : i32
    return %arg0, %c0_i32, %c0_i32_0 : i32, i32, i32
  }
}

</mosaic_0001>

<bundles_post_ra>
// kernel: tile.13
= control target key start
LH: loop header
LB: loop body
LE: loop exit
PB: predicated region body
PF: predicated region fallthrough
CT: control target
= control target key end

     0   :  { %s28_s0 = inlined_call_operand.vmem [shape: f32[8], index: 0, kind: input, shape index: {}]   ;;  %s29_s1 = inlined_call_operand.vmem [shape: f32[16,8], index: 1, kind: output, shape index: {}]  }
   0x1   :  { %v4_v0 = vld [vmem:[%s28_s0] ss:$0 sm:$0xff] }
   0x2   :  { %5 = vst [vmem:[%s29_s1] sm:$0xff] %v4_v0 }
   0x3   :  { %8 = vst [vmem:[%s29_s1 + $0x8] sm:$0xff] %v4_v0 }

// kernel: tile.14
= control target key start
LH: loop header
LB: loop body
LE: loop exit
PB: predicated region body
PF: predicated region fallthrough
CT: control target
= control target key end

     0   :  { %s131_s10 = smov 120   ;;  %s132_s11 = smov 104   ;;  %vm3_vm0 = vcmask 64512   ;;  %vm9_vm1 = vcmask 1048512   ;;  %vm15_vm2 = vcmask 982912   ;;  %vm21_vm3 = vcmask 917312   ;;  %s207_s0 = inlined_call_operand.vmem [shape: f32[16,8], index: 0, kind: input, shape index: {}]   ;;  %s208_s1 = inlined_call_operand.vmem [shape: f32[1,128], index: 1, kind: output, shape index: {}]  }
   0x1   :  { %v101_v0 = vld [vmem:[%s207_s0 + $0xf] sm:$0x1]   ;;  %v103_v1 = vld [vmem:[%s207_s0 + $0xd] sm:$0x1]   ;;  %v105_v2 = vld [vmem:[%s207_s0 + $0xb] sm:$0x1]  }
   0x2   :  { %7 = vrot.lane.b32.xlu0 %v101_v0, %s131_s10  ;;  %19 = vrot.lane.b32.xlu1 %v103_v1, %s132_s11  ;;  %s133_s14 = smov 88   ;;  %v102_v3 = vld [vmem:[%s207_s0 + $0xe] sm:$0x1]   ;;  %v104_v4 = vld [vmem:[%s207_s0 + $0xc] sm:$0x1]   ;;  %s134_s19 = smov 112  }
   0x3   :  { %31 = vrot.lane.b32.xlu2 %v105_v2, %s133_s14  ;;  %s135_s20 = smov 96   ;;  %v106_v5 = vld [vmem:[%s207_s0 + $0xa] sm:$0x1]   ;;  %s136_s23 = smov 80   ;;  %v107_v6 = vld [vmem:[%s207_s0 + $0x9] sm:$0x1]  }
   0x4   :  { %v108_v7 = vld [vmem:[%s207_s0 + $0x8] sm:$0x1]   ;;  %s137_s28 = smov 72   ;;  %s138_s29 = smov 64   ;;  %v109_v8 = vld [vmem:[%s207_s0 + $0x7] sm:$0x1]  }
   0x5   :  { %s139_s3 = smov 56   ;;  %v110_v9 = vld [vmem:[%s207_s0 + $0x6] sm:$0x1]   ;;  %v111_v10 = vld [vmem:[%s207_s0 + $0x5] sm:$0x1]   ;;  %s140_s8 = smov 48  }
   0x6   :  { %s141_s9 = smov 40   ;;  %v112_v11 = vld [vmem:[%s207_s0 + $0x4] sm:$0x1]   ;;  %s142_s12 = smov 32   ;;  %v113_v12 = vld [vmem:[%s207_s0 + $0x3] sm:$0x1]  }
   0x7   :  { %v114_v13 = vld [vmem:[%s207_s0 + $0x2] sm:$0x1]   ;;  %s143_s17 = smov 24   ;;  %s144_s18 = smov 16   ;;  %v115_v14 = vld [vmem:[%s207_s0 + $0x1] sm:$0x1]  }
   0x8   :  { %s145_s21 = smov 8   ;;  %v2_v15 = vld [vmem:[%s207_s0] sm:$0x1]   ;;  %vm27_vm4 = vcmask 851712   ;;  %vm33_vm5 = vcmask 786112   ;;  %vm39_vm6 = vcmask 720512  }
   0x9   :  { %4 = vst.msk [vmem:[#allocation0] sm:$0x1] %vm3_vm0, %v2_v15   ;;  %vm45_vm7 = vcmask 654912   ;;  %vm51_vm8 = vcmask 589312   ;;  %vm57_vm9 = vcmask 523712   ;;  %vm63_vm10 = vcmask 458112  }
   0xa   :  { %13 = vrot.lane.b32.xlu0 %v102_v3, %s134_s19  ;;  %25 = vrot.lane.b32.xlu1 %v104_v4, %s135_s20  ;;  %vm69_vm11 = vcmask 392512   ;;  %vm75_vm12 = vcmask 326912   ;;  %vm81_vm13 = vcmask 261312   ;;  %vm87_vm14 = vcmask 195712  }
   0xb   :  { %37 = vrot.lane.b32.xlu2 %v106_v5, %s136_s23  ;;  %vm93_vm15 = vcmask 130112  }
  0x12   :  { %43 = vrot.lane.b32.xlu0 %v107_v6, %s137_s28  ;;  %49 = vrot.lane.b32.xlu1 %v108_v7, %s138_s29 }
  0x13   :  { %55 = vrot.lane.b32.xlu2 %v109_v8, %s139_s3 }
  0x1a   :  { %61 = vrot.lane.b32.xlu0 %v110_v9, %s140_s8  ;;  %67 = vrot.lane.b32.xlu1 %v111_v10, %s141_s9 }
  0x1b   :  { %73 = vrot.lane.b32.xlu2 %v112_v11, %s142_s12 }
  0x22   :  { %79 = vrot.lane.b32.xlu0 %v113_v12, %s143_s17  ;;  %85 = vrot.lane.b32.xlu1 %v114_v13, %s144_s18 }
  0x23   :  { %91 = vrot.lane.b32.xlu2 %v115_v14, %s145_s21 }
  0x5d   :  { %v32_v16 = vpop.permute.xlu2 %31  }
  0x65   :  { %v38_v17 = vpop.permute.xlu2 %37  }
  0x6d   :  { %v56_v18 = vpop.permute.xlu2 %55  }
  0x74   :  { %v8_v19 = vpop.permute.xlu0 %7   ;;  %v20_v20 = vpop.permute.xlu1 %19  }
  0x75   :  { %10 = vst.msk [vmem:[#allocation0] sm:$0x1] %vm9_vm1, %v8_v19   ;;  %v74_v21 = vpop.permute.xlu2 %73  }
  0x7c   :  { %v14_v22 = vpop.permute.xlu0 %13   ;;  %v26_v23 = vpop.permute.xlu1 %25  }
  0x7d   :  { %16 = vst.msk [vmem:[#allocation0] sm:$0x1] %vm15_vm2, %v14_v22   ;;  %v92_v24 = vpop.permute.xlu2 %91  }
  0x7e   :  { %22 = vst.msk [vmem:[#allocation0] sm:$0x1] %vm21_vm3, %v20_v20  }
  0x7f   :  { %28 = vst.msk [vmem:[#allocation0] sm:$0x1] %vm27_vm4, %v26_v23  }
  0x80   :  { %34 = vst.msk [vmem:[#allocation0] sm:$0x1] %vm33_vm5, %v32_v16  }
  0x81   :  { %40 = vst.msk [vmem:[#allocation0] sm:$0x1] %vm39_vm6, %v38_v17  }
  0x84   :  { %v44_v25 = vpop.permute.xlu0 %43   ;;  %v50_v26 = vpop.permute.xlu1 %49  }
  0x85   :  { %46 = vst.msk [vmem:[#allocation0] sm:$0x1] %vm45_vm7, %v44_v25  }
  0x86   :  { %52 = vst.msk [vmem:[#allocation0] sm:$0x1] %vm51_vm8, %v50_v26  }
  0x87   :  { %58 = vst.msk [vmem:[#allocation0] sm:$0x1] %vm57_vm9, %v56_v18  }
  0x8c   :  { %v62_v27 = vpop.permute.xlu0 %61   ;;  %v68_v28 = vpop.permute.xlu1 %67  }
  0x8d   :  { %64 = vst.msk [vmem:[#allocation0] sm:$0x1] %vm63_vm10, %v62_v27  }
  0x8e   :  { %70 = vst.msk [vmem:[#allocation0] sm:$0x1] %vm69_vm11, %v68_v28  }
  0x8f   :  { %76 = vst.msk [vmem:[#allocation0] sm:$0x1] %vm75_vm12, %v74_v21  }
  0x94   :  { %v80_v29 = vpop.permute.xlu0 %79   ;;  %v86_v30 = vpop.permute.xlu1 %85  }
  0x95   :  { %82 = vst.msk [vmem:[#allocation0] sm:$0x1] %vm81_vm13, %v80_v29  }
  0x96   :  { %88 = vst.msk [vmem:[#allocation0] sm:$0x1] %vm87_vm14, %v86_v30  }
  0x97   :  { %94 = vst.msk [vmem:[#allocation0] sm:$0x1] %vm93_vm15, %v92_v24  }
  0x9e   :  { %v97_v31 = vld [vmem:[#allocation0] sm:$0x1] }
  0x9f   :  { %100 = vst [vmem:[%s208_s1] sm:$0x1] %v97_v31 }

// kernel: cbr_forward.2
= control target key start
LH: loop header
LB: loop body
LE: loop exit
PB: predicated region body
PF: predicated region fallthrough
CT: control target
= control target key end

     0   :  { %s606_s12 = smov 0   ;;  %s673_s0 = inlined_call_operand.vmem [shape: bf16[2,16,64], index: 0, kind: input, shape index: {}]   ;;  %s674_s1 = inlined_call_operand.vmem [shape: bf16[3,64,128], index: 1, kind: input, shape index: {}]   ;;  %s675_s2 = inlined_call_operand.vmem [shape: f32[2,1,128], index: 2, kind: output, shape index: {0}]   ;;  %s676_s3 = inlined_call_operand.vmem [shape: f32[2,1,128], index: 3, kind: output, shape index: {1}]  }
   0x1 LB: > { %s475_s13 = sadd.s32 4294967295, %s583_s12   ;;  %p479_p0 = scmp.ge.s32.totalorder %s583_s12, 1  ;;  %s583_s12 = sphi %s606_s12, %s14_s12  }
   0x2   : > { %p140_p1 = scmp.lt.s32.totalorder %s583_s12, 3 }
   0x4   : > { %p141_p2 = pnand %p479_p0, %p140_p1 }
   0x5   : > { %p165_p3 = scmp.lt.s32.totalorder (!%p141_p2), %s475_s13, 1 }
   0x6   : > { %144 = sbr.rel (%p141_p2) target bundleno = 195 (0xc3), region = 28 }
   0xb   : > { %v555_v0 = vld [vmem:[%s674_s1 + $0x18] sm:$0xff]  ;;  %vm177_vm0 = vcmask 519168   ;;  %v585_v3 = vmov 0   ;;  %vm180_vm1 = vcmask 517120   ;;  %v554_v4 = vld [vmem:[%s674_s1 + $0x10] sm:$0xff]  ;;  %s678_s13 = smov (!%p165_p3, %s475_s13), 1 }
   0xc   : > { %v559_v1 = vld [vmem:[%s674_s1 + $0x38] sm:$0xff]  ;;  %178 = vst.msk [vmem:[#allocation2] sm:$0xf] %vm177_vm0, %v585_v3  ;;  %311 = vmatpush.bf16.msra.mxu1 %v555_v0  ;;  %v558_v5 = vld [vmem:[%s674_s1 + $0x30] sm:$0xff]  ;;  %s551_s26 = sshll.u32 %s678_s13, 3  ;;  %v553_v7 = vld [vmem:[%s674_s1 + $0x8] sm:$0xff]  ;;  %s172_s19 = scalar_lea.vmem %s675_s2, %s678_s13 }
   0xd   : > { %v563_v2 = vld [vmem:[%s674_s1 + $0x58] sm:$0xff]  ;;  %267 = vmatpush.bf16.msra.mxu0 %v559_v1  ;;  %179 = vst.msk [vmem:[#allocation2 + $0x4] sm:$0xf] %vm177_vm0, %v585_v3  ;;  %v562_v6 = vld [vmem:[%s674_s1 + $0x50] sm:$0xff]  ;;  %s169_s4 = scalar_lea.vmem %s673_s0, %s551_s26  ;;  %vm186_vm2 = vcmask 1040384   ;;  %vm187_vm3 = vcmask 1044484   ;;  %s175_s22 = scalar_lea.vmem %s676_s3, %s678_s13 }
   0xe   : > { %373 = vmatpush.bf16.msra.mxu2 %v563_v2  ;;  %181 = vst.msk [vmem:[#allocation2 + $0x8] sm:$0x3] %vm180_vm1, %v585_v3  ;;  %v557_v8 = vld [vmem:[%s674_s1 + $0x28] sm:$0xff]  ;;  %v182_v9 = vld [vmem:[%s169_s4] sm:$0xf]  ;;  %vm197_vm4 = vcmask 519169   ;;  %vm188_vm5 = vmor %vm186_vm2, %vm187_vm3 }
   0xf   : > { %v183_v10 = vld [vmem:[%s169_s4 + $0x4] sm:$0xf]  ;;  %v561_v11 = vld [vmem:[%s674_s1 + $0x48] sm:$0xff]  ;;  %v189_v12 = vrot.slane %v182_v9, 7  ;;  %vm200_vm6 = vcmask 516096   ;;  %vm259_vm7 = vcmask 523264  }
  0x10   : > { %312 = vmatpush.bf16.msra.mxu1 %v554_v4  ;;  %v191_v13 = vrot.slane %v183_v10, 7  ;;  %v552_v16 = vld [vmem:[%s674_s1] sm:$0xff]  ;;  %vm231_vm8 = vcmask 1046528   ;;  %vm338_vm9 = vcmask 1045504  }
  0x11   : > { %268 = vmatpush.bf16.msra.mxu0 %v558_v5  ;;  %v190_v14 = vrot.slane %v189_v12, 4  ;;  %198 = vst.msk [vmem:[#allocation2] sm:$0xe] %vm197_vm4, %v189_v12  ;;  %v556_v17 = vld [vmem:[%s674_s1 + $0x20] sm:$0xff] }
  0x12   : > { %374 = vmatpush.bf16.msra.mxu2 %v562_v6  ;;  %v193_v15 = vrot.slane %v191_v13, 4  ;;  %v560_v19 = vld [vmem:[%s674_s1 + $0x40] sm:$0xff] }
  0x13   : > { %v192_v18 = vsel %vm188_vm5, %v190_v14, %v191_v13 }
  0x14   : > { %313 = vmatpush.bf16.msra.mxu1 %v553_v7  ;;  %201 = vst.msk [vmem:[#allocation2 + $0x8] sm:$0x1] %vm200_vm6, %v193_v15 }
  0x15   : > { %269 = vmatpush.bf16.msra.mxu0 %v557_v8  ;;  %199 = vst.msk [vmem:[#allocation2 + $0x4] sm:$0xf] %vm177_vm0, %v192_v18 }
  0x16   : > { %375 = vmatpush.bf16.msra.mxu2 %v561_v11 }
  0x18   : > { %314 = vmatpush.bf16.msra.mxu1 %v552_v16  ;;  %v212_v20 = vld [vmem:[#allocation2] sm:$0xe] }
  0x19   : > { %270 = vmatpush.bf16.msra.mxu0 %v556_v17  ;;  %v321_v21 = vld [vmem:[#allocation2] sm:$0xc]  ;;  %v226_v22 = vunpack.c.l.b16 %v212_v20 }
  0x1a   : > { %376 = vmatpush.bf16.msra.mxu2 %v560_v19  ;;  %v334_v23 = vunpack.c.l.b16 %v321_v21 }
  0x1b   : > { %v213_v24 = vld [vmem:[#allocation2 + $0x8] sm:$0x1] }
  0x1c   : > { %v322_v25 = vld [vmem:[#allocation2 + $0x8] sm:$0x3]  ;;  %v565_v26 = vld [vmem:[#allocation2] sm:$0xff]   ;;  %v228_v27 = vunpack.c.l.b16 %v213_v24 }
  0x1d   : > { %v335_v28 = vunpack.c.l.b16 %v322_v25  ;;  %v567_v29 = vunpack.c.h.b16 %v565_v26  ;;  %523 = vmatmul.msk.bf16.vlgmr.msra.gmra.mxu1 %vm259_vm7, %v565_v26 }
  0x1e   : > { %v230_v30 = vpack.c.b16 %v228_v27, %v228_v27 }
  0x1f   : > { %v337_v31 = vpack.c.b16 %v335_v28, %v335_v28  ;;  %v229_v32 = vpack.c.b16 %v567_v29, %v226_v22  ;;  %v336_v33 = vpack.c.b16 %v567_v29, %v334_v23 }
  0x20   : > { %v233_v34 = vrot.slane %v230_v30, 1 }
  0x21   : > { %v340_v35 = vrot.slane %v337_v31, 2  ;;  %v232_v36 = vrot.slane %v229_v32, 1  ;;  %v339_v37 = vrot.slane %v336_v33, 2 }
  0x23   : > { %v234_v38 = vsel %vm231_vm8, %v232_v36, %v233_v34  ;;  %v341_v39 = vsel %vm338_vm9, %v339_v37, %v340_v35 }
  0x24   : > { %506 = vmatmul.msk.bf16.vlgmr.msra.gmra.mxu0 %vm259_vm7, %v234_v38  ;;  %548 = vmatmul.msk.bf16.vlgmr.msra.gmra.mxu2 %vm259_vm7, %v341_v39 }
  0x9a   : > { %v316_v41 = vpop.f32.mrf.mxu1 }
  0xa1   : > { %v272_v40 = vpop.f32.mrf.mxu0 }
  0xa2   : > { %v317_v43 = vadd.f32 %v316_v41, %v272_v40  ;;  %v318_v45 = vpop.f32.mrf.mxu1 }
  0xa7   : > { %v378_v42 = vpop.f32.mrf.mxu2 }
  0xa8   : > { %v383_v46 = vadd.f32 %v378_v42, %v317_v43 }
  0xa9   : > { %v274_v44 = vpop.f32.mrf.mxu0 }
  0xaa   : > { %v319_v47 = vadd.f32 %v318_v45, %v274_v44  ;;  %v393_v50 = vmul.f32 %v383_v46, %v383_v46 }
  0xaf   : > { %v380_v48 = vpop.f32.mrf.mxu2 }
  0xb0   : > { %v384_v49 = vadd.f32 %v380_v48, %v319_v47 }
  0xb2   : > { %v385_v51 = vadd.f32 %v384_v49, %v383_v46  ;;  %v394_v52 = vmul.f32 %v384_v49, %v384_v49 }
  0xb4   : > { %v386_v53 = vrot.slane %v385_v51, 4  ;;  %v395_v54 = vadd.f32 %v394_v52, %v393_v50 }
  0xb6   : > { %v387_v55 = vadd.f32 %v386_v53, %v385_v51  ;;  %v396_v56 = vrot.slane %v395_v54, 4 }
  0xb8   : > { %v388_v57 = vrot.slane %v387_v55, 2  ;;  %v397_v58 = vadd.f32 %v396_v56, %v395_v54 }
  0xba   : > { %v389_v59 = vadd.f32 %v388_v57, %v387_v55  ;;  %v398_v60 = vrot.slane %v397_v58, 2 }
  0xbc   : > { %v390_v61 = vrot.slane %v389_v59, 1  ;;  %v399_v62 = vadd.f32 %v398_v60, %v397_v58 }
  0xbe   : > { %v391_v63 = vadd.f32 %v390_v61, %v389_v59  ;;  %v400_v0 = vrot.slane %v399_v62, 1 }
  0xc0   : > { %392 = vst [vmem:[%s172_s19] sm:$0x1] %v391_v63  ;;  %v401_v1 = vadd.f32 %v400_v0, %v399_v62 }
  0xc2   : > { %402 = vst [vmem:[%s175_s22] sm:$0x1] %v401_v1 }
  0xc3 PF: > { %s14_s12 = sadd.s32 1, %s583_s12  }
  0xc4   : > { %p11_p4 = scmp.ge.s32.totalorder %s14_s12, 4  }
  0xc6   :  { %13 = sbr.rel (!%p11_p4) target bundleno = 1 (0x1), region = 72 }

// kernel: cbr_forward.3
= control target key start
LH: loop header
LB: loop body
LE: loop exit
PB: predicated region body
PF: predicated region fallthrough
CT: control target
= control target key end

     0   :  { %s619_s15 = smov 0   ;;  %s688_s0 = inlined_call_operand.vmem [shape: bf16[2,16,64], index: 0, kind: input, shape index: {}]   ;;  %s689_s1 = inlined_call_operand.vmem [shape: bf16[3,64,128], index: 1, kind: input, shape index: {}]   ;;  %s690_s2 = inlined_call_operand.vmem [shape: f32[1,128], index: 2, kind: input, shape index: {}]   ;;  %s691_s3 = inlined_call_operand.vmem [shape: f32[1,128], index: 3, kind: input, shape index: {}]   ;;  %s692_s4 = inlined_call_operand.vmem [shape: f32[2,16,128], index: 4, kind: output, shape index: {}]  }
   0x1 LB: > { %s478_s16 = sadd.s32 4294967295, %s591_s15   ;;  %p482_p0 = scmp.ge.s32.totalorder %s591_s15, 1  ;;  %s591_s15 = sphi %s619_s15, %s14_s15  }
   0x2   : > { %p162_p1 = scmp.lt.s32.totalorder %s591_s15, 3 }
   0x4   : > { %p163_p2 = pnand %p482_p0, %p162_p1 }
   0x5   : > { %p188_p3 = scmp.lt.s32.totalorder (!%p163_p2), %s478_s16, 1 }
   0x6   : > { %166 = sbr.rel (%p163_p2) target bundleno = 185 (0xb9), region = 36 }
   0xb   : > { %v561_v0 = vld [vmem:[%s689_s1 + $0x18] sm:$0xff]  ;;  %vm199_vm0 = vcmask 519168   ;;  %v593_v3 = vmov 0   ;;  %vm202_vm1 = vcmask 517120   ;;  %v560_v4 = vld [vmem:[%s689_s1 + $0x10] sm:$0xff]  ;;  %s694_s16 = smov (!%p188_p3, %s478_s16), 1 }
   0xc   : > { %v565_v1 = vld [vmem:[%s689_s1 + $0x38] sm:$0xff]  ;;  %200 = vst.msk [vmem:[#allocation2] sm:$0xf] %vm199_vm0, %v593_v3  ;;  %333 = vmatpush.bf16.msra.mxu1 %v561_v0  ;;  %v564_v5 = vld [vmem:[%s689_s1 + $0x30] sm:$0xff]  ;;  %v559_v7 = vld [vmem:[%s689_s1 + $0x8] sm:$0xff]  ;;  %s556_s5 = sshll.u32 %s694_s16, 3 }
   0xd   : > { %v569_v2 = vld [vmem:[%s689_s1 + $0x58] sm:$0xff]  ;;  %289 = vmatpush.bf16.msra.mxu0 %v565_v1  ;;  %201 = vst.msk [vmem:[#allocation2 + $0x4] sm:$0xf] %vm199_vm0, %v593_v3  ;;  %v568_v6 = vld [vmem:[%s689_s1 + $0x50] sm:$0xff]  ;;  %s192_s8 = scalar_lea.vmem %s688_s0, %s556_s5  ;;  %vm208_vm2 = vcmask 1040384   ;;  %vm209_vm3 = vcmask 1044484  }
   0xe   : > { %395 = vmatpush.bf16.msra.mxu2 %v569_v2  ;;  %203 = vst.msk [vmem:[#allocation2 + $0x8] sm:$0x3] %vm202_vm1, %v593_v3  ;;  %v563_v8 = vld [vmem:[%s689_s1 + $0x28] sm:$0xff]  ;;  %v204_v9 = vld [vmem:[%s192_s8] sm:$0xf]  ;;  %vm219_vm4 = vcmask 519169   ;;  %vm210_vm5 = vmor %vm208_vm2, %vm209_vm3 }
   0xf   : > { %v205_v10 = vld [vmem:[%s192_s8 + $0x4] sm:$0xf]  ;;  %v567_v11 = vld [vmem:[%s689_s1 + $0x48] sm:$0xff]  ;;  %v211_v12 = vrot.slane %v204_v9, 7  ;;  %vm222_vm6 = vcmask 516096   ;;  %vm281_vm7 = vcmask 523264  }
  0x10   : > { %334 = vmatpush.bf16.msra.mxu1 %v560_v4  ;;  %v213_v13 = vrot.slane %v205_v10, 7  ;;  %v558_v16 = vld [vmem:[%s689_s1] sm:$0xff]  ;;  %vm253_vm8 = vcmask 1046528   ;;  %vm360_vm9 = vcmask 1045504   ;;  %s557_s25 = sshll.u32 %s694_s16, 4 }
  0x11   : > { %290 = vmatpush.bf16.msra.mxu0 %v564_v5  ;;  %v212_v14 = vrot.slane %v211_v12, 4  ;;  %220 = vst.msk [vmem:[#allocation2] sm:$0xe] %vm219_vm4, %v211_v12  ;;  %v562_v17 = vld [vmem:[%s689_s1 + $0x20] sm:$0xff]  ;;  %s197_s28 = scalar_lea.vmem %s692_s4, %s557_s25 }
  0x12   : > { %396 = vmatpush.bf16.msra.mxu2 %v568_v6  ;;  %v215_v15 = vrot.slane %v213_v13, 4  ;;  %v566_v19 = vld [vmem:[%s689_s1 + $0x40] sm:$0xff] }
  0x13   : > { %v214_v18 = vsel %vm210_vm5, %v212_v14, %v213_v13  ;;  %v583_v43 = vld [vmem:[%s690_s2] ss:$0 sm:$0xff] }
  0x14   : > { %335 = vmatpush.bf16.msra.mxu1 %v559_v7  ;;  %223 = vst.msk [vmem:[#allocation2 + $0x8] sm:$0x1] %vm222_vm6, %v215_v15  ;;  %v584_v46 = vld [vmem:[%s691_s3] ss:$0 sm:$0xff] }
  0x15   : > { %291 = vmatpush.bf16.msra.mxu0 %v563_v8  ;;  %221 = vst.msk [vmem:[#allocation2 + $0x4] sm:$0xf] %vm199_vm0, %v214_v18 }
  0x16   : > { %397 = vmatpush.bf16.msra.mxu2 %v567_v11 }
  0x18   : > { %336 = vmatpush.bf16.msra.mxu1 %v558_v16  ;;  %v234_v20 = vld [vmem:[#allocation2] sm:$0xe] }
  0x19   : > { %292 = vmatpush.bf16.msra.mxu0 %v562_v17  ;;  %v343_v21 = vld [vmem:[#allocation2] sm:$0xc]  ;;  %v248_v22 = vunpack.c.l.b16 %v234_v20 }
  0x1a   : > { %398 = vmatpush.bf16.msra.mxu2 %v566_v19  ;;  %v356_v23 = vunpack.c.l.b16 %v343_v21 }
  0x1b   : > { %v235_v24 = vld [vmem:[#allocation2 + $0x8] sm:$0x1] }
  0x1c   : > { %v344_v25 = vld [vmem:[#allocation2 + $0x8] sm:$0x3]  ;;  %v571_v26 = vld [vmem:[#allocation2] sm:$0xff]   ;;  %v250_v27 = vunpack.c.l.b16 %v235_v24 }
  0x1d   : > { %v357_v28 = vunpack.c.l.b16 %v344_v25  ;;  %v573_v29 = vunpack.c.h.b16 %v571_v26  ;;  %528 = vmatmul.msk.bf16.vlgmr.msra.gmra.mxu1 %vm281_vm7, %v571_v26 }
  0x1e   : > { %v252_v30 = vpack.c.b16 %v250_v27, %v250_v27 }
  0x1f   : > { %v359_v31 = vpack.c.b16 %v357_v28, %v357_v28  ;;  %v251_v32 = vpack.c.b16 %v573_v29, %v248_v22  ;;  %v358_v33 = vpack.c.b16 %v573_v29, %v356_v23 }
  0x20   : > { %v255_v34 = vrot.slane %v252_v30, 1 }
  0x21   : > { %v362_v35 = vrot.slane %v359_v31, 2  ;;  %v254_v36 = vrot.slane %v251_v32, 1  ;;  %v361_v37 = vrot.slane %v358_v33, 2 }
  0x23   : > { %v256_v38 = vsel %vm253_vm8, %v254_v36, %v255_v34  ;;  %v363_v39 = vsel %vm360_vm9, %v361_v37, %v362_v35 }
  0x24   : > { %511 = vmatmul.msk.bf16.vlgmr.msra.gmra.mxu0 %vm281_vm7, %v256_v38  ;;  %553 = vmatmul.msk.bf16.vlgmr.msra.gmra.mxu2 %vm281_vm7, %v363_v39 }
  0x9a   : > { %v338_v41 = vpop.f32.mrf.mxu1 }
  0xa1   : > { %v294_v40 = vpop.f32.mrf.mxu0 }
  0xa2   : > { %v339_v42 = vadd.f32 %v338_v41, %v294_v40  ;;  %v340_v50 = vpop.f32.mrf.mxu1 }
  0xa7   : > { %v400_v44 = vpop.f32.mrf.mxu2 }
  0xa8   : > { %v405_v45 = vadd.f32 %v400_v44, %v339_v42 }
  0xa9   : > { %v296_v48 = vpop.f32.mrf.mxu0 }
  0xaa   : > { %v411_v47 = vmul.f32 %v583_v43, %v405_v45  ;;  %v341_v52 = vadd.f32 %v340_v50, %v296_v48 }
  0xac   : > { %v417_v49 = vadd.f32 %v584_v46, %v411_v47 }
  0xae   : > { %v419_v51 = vmax.f32 %v417_v49, 0.0 }
  0xaf   : > { %v402_v53 = vpop.f32.mrf.mxu2 }
  0xb0   : > { %421 = vst [vmem:[%s197_s28] sm:$0xff] %v419_v51  ;;  %v406_v54 = vadd.f32 %v402_v53, %v341_v52 }
  0xb2   : > { %v412_v55 = vmul.f32 %v583_v43, %v406_v54 }
  0xb4   : > { %v418_v56 = vadd.f32 %v584_v46, %v412_v55 }
  0xb6   : > { %v420_v57 = vmax.f32 %v418_v56, 0.0 }
  0xb8   : > { %422 = vst [vmem:[%s197_s28 + $0x8] sm:$0xff] %v420_v57 }
  0xb9 PF: > { %s14_s15 = sadd.s32 1, %s591_s15  }
  0xba   : > { %p11_p4 = scmp.ge.s32.totalorder %s14_s15, 4  }
  0xbc   :  { %13 = sbr.rel (!%p11_p4) target bundleno = 1 (0x1), region = 68 }

</bundles_post_ra>
